<compile_context>
chip_gen: v6e
topology: v6e:2x2x1
jax: 0.10.0
libtpu: 0.0.40
codegen_flags: <defaults>
</compile_context>

<pallas_src>
import jax
import jax.numpy as jnp
from jax.experimental import pallas as pl
from jax.experimental.pallas import tpu as pltpu

_MiB = 1024 * 1024


def _permute_kernel(x_ref, o_ref):
    # x_ref: (t_rows, c_blk) tile of the (H*W, C) view
    # o_ref: (c_blk, t_rows) tile of the (C, H*W) view
    # Single sublane<->lane transpose on the XLU; lane-dense output tile.
    o_ref[...] = jnp.transpose(x_ref[...], (1, 0))


def _round_up(v, m):
    return -(-v // m) * m


def _hw_target_and_vmem_cap():
    """Per-generation DMA tile target (bytes/buffer) and physical VMEM size."""
    try:
        vmem_cap = int(pltpu.get_tpu_info().vmem_capacity_bytes)
    except Exception:
        vmem_cap = 64 * _MiB  # conservative (v7x-sized VMEM)
    # v7x: 64 MiB VMEM but ~3.2 TB/s HBM -> needs ~8 MiB DMAs to amortize the
    # ~0.35 us per-grid-step overhead (>85-90% of roofline).  v5e/v6e
    # (128 MiB VMEM, 0.8-1.4 TB/s) already get there at ~4 MiB.
    target = 8 * _MiB if vmem_cap <= 80 * _MiB else 4 * _MiB
    return target, vmem_cap


def _choose_c_block(c, itemsize, target_bytes):
    """Channel-block size (lane dim of the input tile).

    Keep C whole unless that would force the H*W tile below ~512 rows, which
    would degrade the NCHW writeback into short strided HBM segments and blow
    up the grid-step count.  Tiled blocks must be multiples of 128 lanes.
    """
    if c <= 1024 or c * itemsize * 512 <= target_bytes:
        return c
    cands = [cb for cb in (1024, 512, 256, 128)
             if cb * itemsize * 512 <= target_bytes] or [128]
    for cb in cands:
        if c % cb == 0:
            return cb          # exact divisor -> no ragged C edge
    return cands[0]


def _choose_tile_rows(hw, c_blk, itemsize, target_bytes, n_outer_steps):
    """Rows of the (H*W, C) view processed per grid step.

    Sized off the lane-padded input footprint (~target_bytes per buffer), kept
    a multiple of 128 so the lane-dense output tile satisfies the (8, 128)
    rule, preferring an exact divisor of H*W (every store stays an unmasked
    `vst`), and split so the total grid has >=2 steps for the v7x megacore.
    """
    padded_c = _round_up(max(c_blk, 1), 128)
    t = (target_bytes // (padded_c * itemsize)) // 128 * 128
    t = max(128, int(t))

    if t >= hw:
        t_rows = hw                       # full extent (also covers hw < 128)
    else:
        t_rows = t
        for cand in range(t, 127, -128):  # largest 128-multiple dividing hw
            if hw % cand == 0:
                t_rows = cand
                break

    # Guarantee at least 2 total grid steps so both v7x TensorCores get work.
    if n_outer_steps * pl.cdiv(hw, t_rows) < 2 and hw >= 256:
        half = _round_up(_round_up(hw, 2) // 2, 128)
        t_rows = half
        for cand in range(half, 127, -128):
            if hw % cand == 0 and hw // cand >= 2:
                t_rows = cand
                break
    return t_rows


def _padded_tile_bytes(rows, cols, itemsize):
    # Conservative VMEM footprint of one (rows, cols) tile: round the minor
    # dims up to a (16, 128) layout tile (covers f32/bf16/int8 packing).
    return _round_up(max(rows, 1), 16) * _round_up(max(cols, 1), 128) * itemsize


def permuteo(x):
    """x: (N, H, W, C) -> (N, C, H, W), same dtype (== torch permute(0,3,1,2))."""
    N, H, W, C = x.shape
    HW = H * W
    itemsize = jnp.dtype(x.dtype).itemsize

    # Small-C path: the Pallas tile would lane-pad C up to 128, wasting
    # >= (128/C)x of every DMA and every vreg -> overhead-bound everywhere.
    # TODO(synk): packed/bitcast Pallas variant for small C instead of XLA.
    if C <= 32:
        return jnp.transpose(x, (0, 3, 1, 2))

    target_bytes, vmem_cap = _hw_target_and_vmem_cap()
    c_blk = _choose_c_block(C, itemsize, target_bytes)
    n_c = pl.cdiv(C, c_blk)
    t_rows = _choose_tile_rows(HW, c_blk, itemsize, target_bytes, N * n_c)
    n_t = pl.cdiv(HW, t_rows)

    # Double-buffered input + output tiles must fit the scoped VMEM budget;
    # keep >= 16 MiB headroom below the physical capacity.
    needed = 2 * (_padded_tile_bytes(t_rows, c_blk, itemsize)
                  + _padded_tile_bytes(c_blk, t_rows, itemsize))
    vmem_limit = min(max(2 * needed, 32 * _MiB), vmem_cap - 16 * _MiB)
    vmem_limit = max(vmem_limit, needed + 2 * _MiB)

    # Free, contiguous reshape: present the problem as a 2-D transpose per batch.
    x2d = x.reshape(N, HW, C)

    out2d = pl.pallas_call(
        _permute_kernel,
        out_shape=jax.ShapeDtypeStruct((N, C, HW), x.dtype),
        grid_spec=pltpu.PrefetchScalarGridSpec(
            num_scalar_prefetch=0,
            grid=(N, n_c, n_t),
            in_specs=[
                pl.BlockSpec((pl.Squeezed(), t_rows, c_blk),
                             lambda n, ci, ti: (n, ti, ci)),
            ],
            out_specs=pl.BlockSpec((pl.Squeezed(), c_blk, t_rows),
                                   lambda n, ci, ti: (n, ci, ti)),
        ),
        compiler_params=pltpu.CompilerParams(
            # Every output tile is independent -> all axes parallel; lets v7x
            # shard the grid across its two TensorCores (no-op on v5e/v6e).
            dimension_semantics=("parallel", "parallel", "parallel"),
            vmem_limit_bytes=int(vmem_limit),
        ),
        # Pure data movement: 0 FLOPs, read + write the whole array once.
        cost_estimate=pl.CostEstimate(
            flops=0,
            transcendentals=0,
            bytes_accessed=2 * N * HW * C * itemsize,
        ),
    )(x2d)

    # Free reshape of the lane-dense (N, C, H*W) result back to NCHW.
    return out2d.reshape(N, C, H, W)


if __name__ == "__main__":
    key = jax.random.PRNGKey(0)

    # 1) The typical NHWC image case implied by the module (small C -> the
    #    small-C dispatch path): (2, 16, 16, 4) -> (2, 4, 16, 16).
    x_small = jax.random.normal(key, (2, 16, 16, 4), dtype=jnp.float32)
    out_small = jax.block_until_ready(permuteo(x_small))
    ref_small = jnp.transpose(x_small, (0, 3, 1, 2))
    assert out_small.shape == (2, 4, 16, 16), out_small.shape
    assert out_small.dtype == x_small.dtype
    assert jnp.array_equal(out_small, ref_small), "small-C mismatch"

    # 2) Dense-C case exercising the Pallas transpose kernel with full blocks
    #    and unmasked lane-dense stores: (2, 16, 16, 128) -> (2, 128, 16, 16).
    x_dense = jax.random.normal(key, (2, 16, 16, 128), dtype=jnp.float32)
    out_dense = jax.block_until_ready(permuteo(x_dense))
    assert jnp.array_equal(out_dense, jnp.transpose(x_dense, (0, 3, 1, 2))), \
        "dense-C mismatch"

    # 3) Ragged H*W case (N=1 -> the >=2-step split kicks in, last tile is
    #    partial / edge-masked): (1, 20, 20, 128) -> (1, 128, 20, 20).
    x_ragged = jax.random.normal(key, (1, 20, 20, 128), dtype=jnp.float32)
    out_ragged = jax.block_until_ready(permuteo(x_ragged))
    assert jnp.array_equal(out_ragged, jnp.transpose(x_ragged, (0, 3, 1, 2))), \
        "ragged-HW mismatch"

    print("KERNEL_OK")
</pallas_src>

<mosaic_0001>
module attributes {stable_mosaic.version = 11 : i64} {
  func.func @_permute_kernel(%arg0: i32, %arg1: i32, %arg2: i32, %arg3: memref<1x256x128xf32, #tpu.memory_space<vmem>>, %arg4: memref<1x128x256xf32, #tpu.memory_space<vmem>>) attributes {dimension_semantics = [#tpu.dimension_semantics<parallel>, #tpu.dimension_semantics<parallel>, #tpu.dimension_semantics<parallel>], iteration_bounds = array<i64: 2, 1, 1>, scalar_prefetch = 0 : i64, scratch_operands = 0 : i64, tpu.core_type = #tpu.core_type<tc>, window_params = [{transform_indices = @transform_0, window_bounds = array<i64: 1, 256, 128>}, {transform_indices = @transform_1, window_bounds = array<i64: 1, 128, 256>}]} {
    %c0 = arith.constant 0 : index
    %c0_0 = arith.constant 0 : index
    %c0_1 = arith.constant 0 : index
    %0 = vector.load %arg3[%c0, %c0_0, %c0_1] : memref<1x256x128xf32, #tpu.memory_space<vmem>>, vector<1x256x128xf32>
    %1 = vector.shape_cast %0 : vector<1x256x128xf32> to vector<256x128xf32>
    %2 = tpu.transpose %1, [1, 0] : vector<256x128xf32> -> vector<128x256xf32>
    %c0_2 = arith.constant 0 : index
    %c0_3 = arith.constant 0 : index
    %c0_4 = arith.constant 0 : index
    %3 = vector.load %arg4[%c0_2, %c0_3, %c0_4] : memref<1x128x256xf32, #tpu.memory_space<vmem>>, vector<1x128x256xf32>
    %4 = vector.shape_cast %3 : vector<1x128x256xf32> to vector<128x256xf32>
    %5 = vector.shape_cast %2 : vector<128x256xf32> to vector<1x128x256xf32>
    tpu.vector_store %arg4[%c0_2, %c0_3, %c0_4], %5 {strides = array<i32>} : memref<1x128x256xf32, #tpu.memory_space<vmem>>, vector<1x128x256xf32>,
    return
  }
  func.func @transform_0(%arg0: i32, %arg1: i32, %arg2: i32) -> (i32, i32, i32) {
    %c0_i32 = arith.constant 0 : i32
    return %arg0, %arg2, %arg1 : i32, i32, i32
  }
  func.func @transform_1(%arg0: i32, %arg1: i32, %arg2: i32) -> (i32, i32, i32) {
    %c0_i32 = arith.constant 0 : i32
    return %arg0, %arg1, %arg2 : i32, i32, i32
  }
}

</mosaic_0001>

<bundles_post_ra>
// kernel: tpu_custom_call.1
= control target key start
LH: loop header
LB: loop body
LE: loop exit
PB: predicated region body
PF: predicated region fallthrough
CT: control target
= control target key end

     0   :  { %6 = vsyncpa [#allocation3], 0  ;;  %s836_s0 = inlined_call_operand.hbm [shape: f32[2,256,128], index: 0, kind: input, shape index: {}]   ;;  %s837_s1 = inlined_call_operand.hbm [shape: f32[2,128,256], index: 1, kind: output, shape index: {}]  }
   0x1   :  { %8 = vsyncpa [#allocation3 + $0x1], 0 }
   0x2   :  { %9 = vsyncpa [#allocation4], 0 }
   0x3   :  { %11 = vsyncpa [#allocation4 + $0x1], 0  ;;  %s617_s6 = smov 0   ;;  %s619_s7 = smov 0  }
   0x4   :  { %s621_s8 = smov 0   ;;  %s623_s9 = smov 0  }
   0x5   :  { %s625_s10 = smov 0   ;;  %s627_s11 = smov 0  }
   0x6 LB: > { %s408_s12 = sadd.s32 4294967295, %s599_s11   ;;  %s409_s13 = sadd.s32 4294967294, %s599_s11   ;;  %s599_s11 = sphi %s627_s11, %s17_s11   ;;  %s595_s10 = sphi %s625_s10, %s848_s10   ;;  %s591_s9 = sphi %s623_s9, %s847_s9   ;;  %s587_s8 = sphi %s621_s8, %s846_s8   ;;  %s583_s7 = sphi %s619_s7, %s845_s7   ;;  %s579_s6 = sphi %s617_s6, %s844_s6  }
   0x7   : > { %s36_s14 = sadd.s32 1, %s595_s10  ;;  %s47_s15 = sadd.s32 1, %s587_s8 }
   0x8   : > { %p38_p0 = scmp.ge.s32.totalorder %s36_s14, 2  ;;  %p54_p1 = scmp.ne.s32.totalorder %s587_s8, %s583_s7 }
   0x9   : > { %p55_p2 = scmp.eq.s32.totalorder %s599_s11, 0  ;;  %p60_p3 = scmp.ne.s32.totalorder %s583_s7, %s579_s6 }
   0xa   : > { %s850_s14 = smov (%p38_p0, %s36_s14), 0  ;;  %p61_p5 = scmp.eq.s32.totalorder %s408_s12, 0 }
   0xb   : > { %p658_p4 = por %p55_p2, %p54_p1  ;;  %s40_s17 = ssub.s32 %s595_s10, %s850_s14 }
   0xc   : > { %p88_p6 = scmp.eq.s32.totalorder %s408_s12, 1  ;;  %p45_p7 = scmp.eq.s32.totalorder %s40_s17, 0 }
   0xd   : > { %p664_p8 = por %p61_p5, %p60_p3  ;;  %p94_p10 = scmp.eq.s32.totalorder %s409_s13, 1 }
   0xe   : > { %p668_p9 = por %p88_p6, %p54_p1  ;;  %p437_p13 = scmp.lt.s32.totalorder %s599_s11, 2 }
   0xf   : > { %s673_s20 = scalar_select %p45_p7, %s587_s8, %s47_s15  }
  0x10   : > { %p675_p11 = por %p94_p10, %p60_p3  ;;  %s114_s22 = sand.u32 1, %s587_s8  }
  0x11   : > { %s412_s23 = sshll.u32 %s114_s22, 8  ;;  %s423_s24 = sshll.u32 %s595_s10, 12 }
  0x12   : > { %s127_s27 = scalar_lea.hbm %s836_s0, %s423_s24  ;;  %s118_s28 = scalar_lea.vmem [#allocation2], %s412_s23 }
  0x13   : > { %s128_s29 = sshll.u32 %s118_s28, 4  ;;  %p688_p0 = pnand %p437_p13, %p658_p4  ;;  %s129_s29 = int_to_ptr.vmem [resolvable:$true] %s128_s29 }
  0x14   : > { %p415_p1 = scmp.ge.s32.totalorder %s599_s11, 1  ;;  %s115_s2 = scalar_lea.sflag [#allocation3], %s114_s22 }
  0x15   : > { %p493_p2 = pneg %p688_p0  ;;  %s504_s3 = scalar_lea.vmem %s129_s29, 4096 }
  0x16   : > { %p505_p3 = scmp.ne.s32.totalorder %s129_s29, %s504_s3  ;;  %s601_s4 = smov [#allocation2]  }
  0x17   : > { %s509_s5 = sshll.u32 %s601_s4, 4  ;;  %s510_s5 = int_to_ptr.vmem [resolvable:$false] %s509_s5 }
  0x18   : > { %p507_p5 = pnand %p505_p3, %p493_p2  ;;  %s511_s12 = scalar_lea.vmem %s510_s5, 8192 }
  0x19   : > { %p512_p7 = scmp.lt.s32.totalorder %s129_s29, %s510_s5  ;;  %p513_p10 = scmp.lt.s32.totalorder %s511_s12, %s504_s3 }
  0x1a   : > { %p508_p6 = pneg %p507_p5 }
  0x1b   : > { %p514_p12 = por %p513_p10, %p512_p7 }
  0x1d   : > { %p515_p4 = pnand %p514_p12, %p508_p6 }
  0x1f   : > { %518 = shalt.err (!%p515_p4)
}
  0x20   : > { %s602_s13 = smov 128   ;;  %s603_s15 = smov 8  }
  0x21   : > { %432 = dma.hbm_to_vmem [thread:$0]  (!%p688_p0), %s127_s27, 4096, %s129_s29, %s115_s2, %s602_s13, %s602_s13, %s603_s15  }
  0x22   : > { %p136_p13 = scmp.lt.s32.totalorder %s599_s11, 3 }
  0x24   : > { %p137_p2 = pnand %p415_p1, %p136_p13 }
  0x25   : > { %s701_s16 = sand.u32 (!%p137_p2), 1, %s583_s7  }
  0x26   : > { %140 = sbr.rel (%p137_p2) target bundleno = 245 (0xf5), region = 24  ;;  %s416_s17 = sshll.u32 (!%p137_p2), %s701_s16, 8 }
  0x27   : > { %s143_s22 = scalar_lea.sflag (!%p137_p2), [#allocation3], %s701_s16  ;;  %s707_s23 = scalar_lea.vmem (!%p137_p2), [#allocation2], %s416_s17 }
  0x2b   : > { %570 = dma.done.wait (%p664_p8), %s143_s22, 4096  }
  0x2c   : > { %572 = vsyncadd (%p664_p8), %s143_s22, 4294963200  ;;  %v184_v0 = vld [vmem:[%s707_s23 + $0x80] sm:$0xff]  ;;  %v185_v2 = vld [vmem:[%s707_s23 + $0x88] sm:$0xff]  ;;  %s747_s18 = scalar_lea.vmem [#allocation5], %s416_s17  ;;  %s424_s24 = sshll.u32 %s591_s9, 12 }
  0x2d   : > { %v168_v1 = vld [vmem:[%s707_s23] sm:$0xff]  ;;  %232 = vxpose.xlu1.b32.start [1/16] %v184_v0, 128  ;;  %v169_v3 = vld [vmem:[%s707_s23 + $0x8] sm:$0xff]  ;;  %v186_v4 = vld [vmem:[%s707_s23 + $0x90] sm:$0xff]  ;;  %s315_s25 = sshll.u32 %s747_s18, 4  ;;  %s784_s28 = scalar_lea.hbm %s837_s1, %s424_s24  ;;  %s786_s25 = int_to_ptr.vmem [resolvable:$true] %s315_s25 }
  0x2e   : > { %200 = vxpose.xlu0.b32.start [1/16] %v168_v1, 128  ;;  %v170_v5 = vld [vmem:[%s707_s23 + $0x10] sm:$0xff]  ;;  %v187_v6 = vld [vmem:[%s707_s23 + $0x98] sm:$0xff]  ;;  %v188_v8 = vld [vmem:[%s707_s23 + $0xa0] sm:$0xff]  ;;  %s297_s9 = scalar_lea.sflag [#allocation4], %s701_s16  ;;  %s519_s29 = scalar_lea.vmem %s786_s25, 4096 }
  0x2f   : > { %v171_v7 = vld [vmem:[%s707_s23 + $0x18] sm:$0xff]  ;;  %v172_v9 = vld [vmem:[%s707_s23 + $0x20] sm:$0xff]  ;;  %v189_v10 = vld [vmem:[%s707_s23 + $0xa8] sm:$0xff]  ;;  %p520_p8 = scmp.ne.s32.totalorder %s786_s25, %s519_s29  ;;  %s604_s30 = smov [#allocation5]  }
  0x30   : > { %v173_v11 = vld [vmem:[%s707_s23 + $0x28] sm:$0xff]  ;;  %v190_v12 = vld [vmem:[%s707_s23 + $0xb0] sm:$0xff]  ;;  %v191_v14 = vld [vmem:[%s707_s23 + $0xb8] sm:$0xff]  ;;  %s523_s2 = sshll.u32 %s604_s30, 4  ;;  %s524_s2 = int_to_ptr.vmem [resolvable:$false] %s523_s2 }
  0x31   : > { %233 = vxpose.xlu1.b32.cont [2/16] %v185_v2, 128  ;;  %v174_v13 = vld [vmem:[%s707_s23 + $0x30] sm:$0xff]  ;;  %v175_v15 = vld [vmem:[%s707_s23 + $0x38] sm:$0xff]  ;;  %v192_v16 = vld [vmem:[%s707_s23 + $0xc0] sm:$0xff]  ;;  %p521_p12 = pnand %p520_p8, %p668_p9  ;;  %s525_s3 = scalar_lea.vmem %s524_s2, 8192 }
  0x32   : > { %201 = vxpose.xlu0.b32.cont [2/16] %v169_v3, 128  ;;  %v176_v17 = vld [vmem:[%s707_s23 + $0x40] sm:$0xff]  ;;  %v193_v18 = vld [vmem:[%s707_s23 + $0xc8] sm:$0xff]  ;;  %v194_v20 = vld [vmem:[%s707_s23 + $0xd0] sm:$0xff]  ;;  %p526_p1 = scmp.lt.s32.totalorder %s786_s25, %s524_s2  ;;  %p527_p3 = scmp.lt.s32.totalorder %s525_s3, %s519_s29 }
  0x33   : > { %v177_v19 = vld [vmem:[%s707_s23 + $0x48] sm:$0xff]  ;;  %v178_v21 = vld [vmem:[%s707_s23 + $0x50] sm:$0xff]  ;;  %v195_v22 = vld [vmem:[%s707_s23 + $0xd8] sm:$0xff]  ;;  %p522_p0 = pneg %p521_p12 }
  0x34   : > { %v179_v23 = vld [vmem:[%s707_s23 + $0x58] sm:$0xff]  ;;  %v196_v24 = vld [vmem:[%s707_s23 + $0xe0] sm:$0xff]  ;;  %v197_v26 = vld [vmem:[%s707_s23 + $0xe8] sm:$0xff]  ;;  %p528_p5 = por %p527_p3, %p526_p1 }
  0x35   : > { %234 = vxpose.xlu1.b32.cont [3/16] %v186_v4, 128  ;;  %v180_v25 = vld [vmem:[%s707_s23 + $0x60] sm:$0xff]  ;;  %v181_v27 = vld [vmem:[%s707_s23 + $0x68] sm:$0xff]  ;;  %v198_v28 = vld [vmem:[%s707_s23 + $0xf0] sm:$0xff] }
  0x36   : > { %202 = vxpose.xlu0.b32.cont [3/16] %v170_v5, 128  ;;  %v182_v29 = vld [vmem:[%s707_s23 + $0x70] sm:$0xff]  ;;  %v199_v30 = vld [vmem:[%s707_s23 + $0xf8] sm:$0xff]  ;;  %p529_p6 = pnand %p528_p5, %p522_p0 }
  0x37   : > { %v183_v31 = vld [vmem:[%s707_s23 + $0x78] sm:$0xff] }
  0x39   : > { %235 = vxpose.xlu1.b32.cont [4/16] %v187_v6, 128 }
  0x3a   : > { %203 = vxpose.xlu0.b32.cont [4/16] %v171_v7, 128 }
  0x3d   : > { %236 = vxpose.xlu1.b32.cont [5/16] %v188_v8, 128 }
  0x3e   : > { %204 = vxpose.xlu0.b32.cont [5/16] %v172_v9, 128 }
  0x41   : > { %237 = vxpose.xlu1.b32.cont [6/16] %v189_v10, 128 }
  0x42   : > { %205 = vxpose.xlu0.b32.cont [6/16] %v173_v11, 128 }
  0x45   : > { %238 = vxpose.xlu1.b32.cont [7/16] %v190_v12, 128 }
  0x46   : > { %206 = vxpose.xlu0.b32.cont [7/16] %v174_v13, 128 }
  0x49   : > { %239 = vxpose.xlu1.b32.cont [8/16] %v191_v14, 128 }
  0x4a   : > { %207 = vxpose.xlu0.b32.cont [8/16] %v175_v15, 128 }
  0x4d   : > { %240 = vxpose.xlu1.b32.cont [9/16] %v192_v16, 128 }
  0x4e   : > { %208 = vxpose.xlu0.b32.cont [9/16] %v176_v17, 128 }
  0x51   : > { %241 = vxpose.xlu1.b32.cont [10/16] %v193_v18, 128 }
  0x52   : > { %209 = vxpose.xlu0.b32.cont [10/16] %v177_v19, 128 }
  0x55   : > { %242 = vxpose.xlu1.b32.cont [11/16] %v194_v20, 128 }
  0x56   : > { %210 = vxpose.xlu0.b32.cont [11/16] %v178_v21, 128 }
  0x59   : > { %243 = vxpose.xlu1.b32.cont [12/16] %v195_v22, 128 }
  0x5a   : > { %211 = vxpose.xlu0.b32.cont [12/16] %v179_v23, 128 }
  0x5d   : > { %244 = vxpose.xlu1.b32.cont [13/16] %v196_v24, 128 }
  0x5e   : > { %212 = vxpose.xlu0.b32.cont [13/16] %v180_v25, 128 }
  0x61   : > { %245 = vxpose.xlu1.b32.cont [14/16] %v197_v26, 128 }
  0x62   : > { %213 = vxpose.xlu0.b32.cont [14/16] %v181_v27, 128 }
  0x65   : > { %246 = vxpose.xlu1.b32.cont [15/16] %v198_v28, 128 }
  0x66   : > { %214 = vxpose.xlu0.b32.cont [15/16] %v182_v29, 128 }
  0x69   : > { %247 = vxpose.xlu1.b32.end [16/16] %v199_v30, 128 }
  0x6a   : > { %215 = vxpose.xlu0.b32.end [16/16] %v183_v31, 128 }
  0xa9   : > { %v248_v32 = vpop.trf.xlu1 }
  0xaa   : > { %v216_v33 = vpop.trf.xlu0  ;;  %265 = vst [vmem:[%s747_s18 + $0x8] sm:$0xff] %v248_v32 }
  0xab   : > { %264 = vst [vmem:[%s747_s18] sm:$0xff] %v216_v33 }
  0xad   : > { %v249_v34 = vpop.trf.xlu1 }
  0xae   : > { %v217_v35 = vpop.trf.xlu0  ;;  %267 = vst [vmem:[%s747_s18 + $0x18] sm:$0xff] %v249_v34 }
  0xaf   : > { %266 = vst [vmem:[%s747_s18 + $0x10] sm:$0xff] %v217_v35 }
  0xb1   : > { %v250_v36 = vpop.trf.xlu1 }
  0xb2   : > { %v218_v37 = vpop.trf.xlu0  ;;  %269 = vst [vmem:[%s747_s18 + $0x28] sm:$0xff] %v250_v36 }
  0xb3   : > { %268 = vst [vmem:[%s747_s18 + $0x20] sm:$0xff] %v218_v37 }
  0xb5   : > { %v251_v38 = vpop.trf.xlu1 }
  0xb6   : > { %v219_v39 = vpop.trf.xlu0  ;;  %271 = vst [vmem:[%s747_s18 + $0x38] sm:$0xff] %v251_v38 }
  0xb7   : > { %270 = vst [vmem:[%s747_s18 + $0x30] sm:$0xff] %v219_v39 }
  0xb9   : > { %v252_v40 = vpop.trf.xlu1 }
  0xba   : > { %v220_v41 = vpop.trf.xlu0  ;;  %273 = vst [vmem:[%s747_s18 + $0x48] sm:$0xff] %v252_v40 }
  0xbb   : > { %272 = vst [vmem:[%s747_s18 + $0x40] sm:$0xff] %v220_v41 }
  0xbd   : > { %v253_v42 = vpop.trf.xlu1 }
  0xbe   : > { %v221_v43 = vpop.trf.xlu0  ;;  %275 = vst [vmem:[%s747_s18 + $0x58] sm:$0xff] %v253_v42 }
  0xbf   : > { %274 = vst [vmem:[%s747_s18 + $0x50] sm:$0xff] %v221_v43 }
  0xc1   : > { %v254_v44 = vpop.trf.xlu1 }
  0xc2   : > { %v222_v45 = vpop.trf.xlu0  ;;  %277 = vst [vmem:[%s747_s18 + $0x68] sm:$0xff] %v254_v44 }
  0xc3   : > { %276 = vst [vmem:[%s747_s18 + $0x60] sm:$0xff] %v222_v45 }
  0xc5   : > { %v255_v46 = vpop.trf.xlu1 }
  0xc6   : > { %v223_v47 = vpop.trf.xlu0  ;;  %279 = vst [vmem:[%s747_s18 + $0x78] sm:$0xff] %v255_v46 }
  0xc7   : > { %278 = vst [vmem:[%s747_s18 + $0x70] sm:$0xff] %v223_v47 }
  0xc9   : > { %v256_v48 = vpop.trf.xlu1 }
  0xca   : > { %v224_v49 = vpop.trf.xlu0  ;;  %281 = vst [vmem:[%s747_s18 + $0x88] sm:$0xff] %v256_v48 }
  0xcb   : > { %280 = vst [vmem:[%s747_s18 + $0x80] sm:$0xff] %v224_v49 }
  0xcd   : > { %v257_v50 = vpop.trf.xlu1 }
  0xce   : > { %v225_v51 = vpop.trf.xlu0  ;;  %283 = vst [vmem:[%s747_s18 + $0x98] sm:$0xff] %v257_v50 }
  0xcf   : > { %282 = vst [vmem:[%s747_s18 + $0x90] sm:$0xff] %v225_v51 }
  0xd1   : > { %v258_v52 = vpop.trf.xlu1 }
  0xd2   : > { %v226_v53 = vpop.trf.xlu0  ;;  %285 = vst [vmem:[%s747_s18 + $0xa8] sm:$0xff] %v258_v52 }
  0xd3   : > { %284 = vst [vmem:[%s747_s18 + $0xa0] sm:$0xff] %v226_v53 }
  0xd5   : > { %v259_v54 = vpop.trf.xlu1 }
  0xd6   : > { %v227_v55 = vpop.trf.xlu0  ;;  %287 = vst [vmem:[%s747_s18 + $0xb8] sm:$0xff] %v259_v54 }
  0xd7   : > { %286 = vst [vmem:[%s747_s18 + $0xb0] sm:$0xff] %v227_v55 }
  0xd9   : > { %v260_v56 = vpop.trf.xlu1 }
  0xda   : > { %v228_v57 = vpop.trf.xlu0  ;;  %289 = vst [vmem:[%s747_s18 + $0xc8] sm:$0xff] %v260_v56 }
  0xdb   : > { %288 = vst [vmem:[%s747_s18 + $0xc0] sm:$0xff] %v228_v57 }
  0xdd   : > { %v261_v58 = vpop.trf.xlu1 }
  0xde   : > { %v229_v59 = vpop.trf.xlu0  ;;  %291 = vst [vmem:[%s747_s18 + $0xd8] sm:$0xff] %v261_v58 }
  0xdf   : > { %290 = vst [vmem:[%s747_s18 + $0xd0] sm:$0xff] %v229_v59 }
  0xe1   : > { %v262_v60 = vpop.trf.xlu1 }
  0xe2   : > { %v230_v61 = vpop.trf.xlu0  ;;  %293 = vst [vmem:[%s747_s18 + $0xe8] sm:$0xff] %v262_v60 }
  0xe3   : > { %292 = vst [vmem:[%s747_s18 + $0xe0] sm:$0xff] %v230_v61 }
  0xe5   : > { %v263_v62 = vpop.trf.xlu1 }
  0xe6   : > { %v231_v63 = vpop.trf.xlu0  ;;  %295 = vst [vmem:[%s747_s18 + $0xf8] sm:$0xff] %v263_v62 }
  0xe7   : > { %294 = vst [vmem:[%s747_s18 + $0xf0] sm:$0xff] %v231_v63 }
  0xe8   : > { %532 = shalt.err (!%p529_p6)
}
  0xe9   : > { %s533_s4 = scalar_lea.hbm %s784_s28, 4096  ;;  %s537_s13 = scalar_lea.hbm %s837_s1, 8192 }
  0xea   : > { %p534_p7 = scmp.ne.s32.totalorder %s784_s28, %s533_s4  ;;  %p538_p13 = scmp.lt.s32.totalorder %s784_s28, %s837_s1 }
  0xeb   : > { %p539_p2 = scmp.lt.s32.totalorder %s537_s13, %s533_s4 }
  0xec   : > { %p535_p10 = pnand %p534_p7, %p668_p9 }
  0xed   : > { %p540_p8 = por %p539_p2, %p538_p13 }
  0xee   : > { %p536_p4 = pneg %p535_p10 }
  0xf0   : > { %p541_p12 = pnand %p540_p8, %p536_p4 }
  0xf2   : > { %544 = shalt.err (!%p541_p12)
}
  0xf3   : > { %s605_s22 = smov 256   ;;  %s606_s23 = smov 16  }
  0xf4   : > { %427 = dma.vmem_to_hbm [thread:$0]  (%p668_p9), %s786_s25, 4096, %s784_s28, %s297_s9, %s605_s22, %s605_s22, %s606_s23  }
  0xf5 PF: > { %s330_s18 = sand.u32 1, %s579_s6   ;;  %p843_p0 = scmp.ge.s32.totalorder %s599_s11, 2 }
  0xf6   : > { %s331_s24 = scalar_lea.sflag [#allocation4], %s330_s18 }
  0xf7   : > { %p434_p1 = pnand %p843_p0, %p675_p11 }
  0xf9   : > { %p435_p3 = pneg %p434_p1 }
  0xfb   : > { %574 = dma.done.wait (%p435_p3), %s331_s24, 4096  }
  0xfc   : > { %576 = vsyncadd (%p435_p3), %s331_s24, 4294963200  ;;  %s17_s11 = sadd.s32 1, %s599_s11   ;;  %s844_s6 = smov %s583_s7 }
  0xfd   : > { %p14_p5 = scmp.ge.s32.totalorder %s17_s11, 4   ;;  %s845_s7 = smov %s587_s8 }
  0xfe   : > { %s846_s8 = smov %s673_s20  ;;  %s847_s9 = smov %s595_s10 }
  0xff   : > { %s848_s10 = smov %s850_s14  ;;  %16 = sbr.rel (!%p14_p5) target bundleno = 6 (0x6), region = 69 }
 0x104   :  { %336 = vsyncpa [#allocation3], 1 }
 0x105   :  { %338 = vsyncpa [#allocation3 + $0x1], 1 }
 0x106   :  { %339 = vsyncpa [#allocation4], 1 }
 0x107   :  { %341 = vsyncpa [#allocation4 + $0x1], 1 }

</bundles_post_ra>
